<compile_context>
chip_gen: v7x
topology: tpu7x:2x2x1
jax: 0.10.0
libtpu: 0.0.40
codegen_flags: <defaults>
</compile_context>

<pallas_src>
import functools
import math

import jax
import jax.numpy as jnp
from jax.experimental import pallas as pl
from jax.experimental.pallas import tpu as pltpu

_INV_SQRT2 = 1.0 / math.sqrt(2.0)


def mlp_kernel(x_ref, w1_ref, b1_ref, w2_ref, b2_ref, o_ref, acc_ref):
    j = pl.program_id(1)

    @pl.when(j == 0)
    def _():
        acc_ref[...] = jnp.zeros_like(acc_ref)

    # fc1 partial: (bb, H) @ (H, th4) on the MXU, f32 accumulation.
    h = jnp.dot(x_ref[...], w1_ref[...], preferred_element_type=jnp.float32)
    h = h + b1_ref[...]                               # f32 bias add (VPU)
    # nn.GELU() default = exact GELU: 0.5 * x * (1 + erf(x / sqrt(2))).
    # TODO(synk): switch to jax.nn.gelu(approximate=True) (tanh on the EUP) if
    # strict PyTorch-exact parity is not required; frees VALU cycles.
    h = 0.5 * h * (1.0 + jax.lax.erf(h * _INV_SQRT2))
    h = h.astype(w2_ref.dtype)                        # bf16 for the 2nd MXU pass
    # fc2 partial over this th4 block, accumulated across the h4 grid axis.
    acc_ref[...] += jnp.dot(h, w2_ref[...], preferred_element_type=jnp.float32)

    @pl.when(j == pl.num_programs(1) - 1)
    def _():
        o_ref[...] = (acc_ref[...] + b2_ref[...]).astype(o_ref.dtype)


def _vmem_capacity_bytes():
    try:
        info = pltpu.get_tpu_info()
        cap = getattr(info, "vmem_capacity_bytes", None)
        if cap:
            return int(cap)
    except Exception:
        pass
    return 64 * 2**20  # conservative: smallest per-TC VMEM (v7x)


def _pick_batch_tile(B, block_b, pack):
    bb = min(block_b, B)
    # Give dual-TensorCore chips >= 2 pipelined steps per core when possible.
    if B >= 4 * 128 and pl.cdiv(B, bb) < 4:
        bb = B // 4
    bb = max(pack, (bb // pack) * pack)   # sublane packing (16 rows for bf16)
    return bb


def _pick_h4_tile(H4, block_h4):
    if H4 % 128 != 0:
        return H4                          # single full block (lane constraint)
    t = min(block_h4, H4)
    t = max(128, (t // 128) * 128)
    while H4 % t != 0:                     # keep the reduction axis exact
        t -= 128
    return t


@functools.partial(jax.jit, static_argnames=("block_b", "block_h4"))
def mlp_forward(x, w1, b1, w2, b2, *, block_b=256, block_h4=512):
    B, H = x.shape
    H4 = w1.shape[1]

    pack = 16 if x.dtype == jnp.bfloat16 else 8
    bb = _pick_batch_tile(B, block_b, pack)
    th4 = _pick_h4_tile(H4, block_h4)
    grid = (pl.cdiv(B, bb), H4 // th4)

    out_dtype = x.dtype                    # bf16 out: half the HBM writeback
    isz = lambda a: jnp.dtype(a.dtype).itemsize

    # --- VMEM budget (no double counting; clamp to real chip capacity) -------
    x_bytes = 2 * bb * H * isz(x)                    # double-buffered x tile
    w1_bytes = 2 * H * th4 * isz(w1)                 # double-buffered w1 block
    w2_bytes = 2 * th4 * H * isz(w2)                 # double-buffered w2 block
    b_bytes = 2 * (th4 * isz(b1) + H * isz(b2))      # bias blocks
    out_bytes = 2 * bb * H * jnp.dtype(out_dtype).itemsize
    acc_bytes = bb * H * 4                           # f32 scratch accumulator
    h_bytes = bb * th4 * 4                           # transient fc1/GELU slice
    vmem_needed = (x_bytes + w1_bytes + w2_bytes + b_bytes
                   + out_bytes + acc_bytes + h_bytes)
    vmem_cap = _vmem_capacity_bytes()
    vmem_limit = int(min(int(0.9 * vmem_cap),
                         max(32 * 2**20, int(1.5 * vmem_needed))))

    cost = pl.CostEstimate(
        flops=4 * B * H * H4,                        # two matmuls
        transcendentals=B * H4,                      # one erf per hidden elem
        bytes_accessed=(x.size * isz(x) + w1.size * isz(w1) + b1.size * isz(b1)
                        + w2.size * isz(w2) + b2.size * isz(b2)
                        + B * H * jnp.dtype(out_dtype).itemsize),
    )

    return pl.pallas_call(
        mlp_kernel,
        out_shape=jax.ShapeDtypeStruct((B, H), out_dtype),
        grid_spec=pltpu.PrefetchScalarGridSpec(
            num_scalar_prefetch=0,
            grid=grid,
            in_specs=[
                pl.BlockSpec((bb, H), lambda i, j: (i, 0)),    # x tile
                pl.BlockSpec((H, th4), lambda i, j: (0, j)),   # w1 column block
                pl.BlockSpec((1, th4), lambda i, j: (0, j)),   # b1 block
                pl.BlockSpec((th4, H), lambda i, j: (j, 0)),   # w2 row block
                pl.BlockSpec((1, H), lambda i, j: (0, 0)),     # b2
            ],
            out_specs=pl.BlockSpec((bb, H), lambda i, j: (i, 0)),
            scratch_shapes=[pltpu.VMEM((bb, H), jnp.float32)],
        ),
        compiler_params=pltpu.CompilerParams(
            dimension_semantics=("parallel", "arbitrary"),
            vmem_limit_bytes=vmem_limit,
        ),
        cost_estimate=cost,
    )(x, w1, b1, w2, b2)


def init_params(key, hidden_dim, w_dtype=jnp.bfloat16, b_dtype=jnp.float32):
    """PyTorch-Linear-style init: U(-1/sqrt(fan_in), 1/sqrt(fan_in))."""
    k1, k2, k3, k4 = jax.random.split(key, 4)
    h, h4 = hidden_dim, hidden_dim * 4
    bound1 = 1.0 / math.sqrt(h)
    bound2 = 1.0 / math.sqrt(h4)
    w1 = jax.random.uniform(k1, (h, h4), jnp.float32, -bound1, bound1).astype(w_dtype)
    b1 = jax.random.uniform(k2, (1, h4), b_dtype, minval=-bound1, maxval=bound1)
    w2 = jax.random.uniform(k3, (h4, h), jnp.float32, -bound2, bound2).astype(w_dtype)
    b2 = jax.random.uniform(k4, (1, h), b_dtype, minval=-bound2, maxval=bound2)
    return w1, b1, w2, b2


if __name__ == "__main__":
    hidden_dim = 128   # fc1: 128x512, fc2: 512x128 (lane-aligned)
    batch = 512        # -> bb=128: 4 batch steps (2 per TC on dual-core chips)
                       # -> th4=256 (multiple of 256): 2 accumulation steps

    key = jax.random.PRNGKey(0)
    kx, kp = jax.random.split(key)
    x = jax.random.normal(kx, (batch, hidden_dim), jnp.float32).astype(jnp.bfloat16)
    w1, b1, w2, b2 = init_params(kp, hidden_dim)

    out = mlp_forward(x, w1, b1, w2, b2, block_b=256, block_h4=256)
    jax.block_until_ready(out)

    # Pure-JAX f32 reference computed from the same (bf16) parameter values.
    xf, w1f, w2f = (a.astype(jnp.float32) for a in (x, w1, w2))
    hp = jnp.dot(xf, w1f, precision=jax.lax.Precision.HIGHEST) + b1
    hp = 0.5 * hp * (1.0 + jax.lax.erf(hp * _INV_SQRT2))
    ref = jnp.dot(hp, w2f, precision=jax.lax.Precision.HIGHEST) + b2

    assert out.shape == (batch, hidden_dim)
    assert out.dtype == x.dtype
    outf = out.astype(jnp.float32)
    max_err = float(jnp.max(jnp.abs(outf - ref)))
    assert jnp.allclose(outf, ref, atol=3e-2, rtol=3e-2), f"max abs err {max_err}"

    print("KERNEL_OK")
</pallas_src>

<mosaic_0001>
module attributes {stable_mosaic.version = 11 : i64} {
  func.func @mlp_kernel(%arg0: i32, %arg1: i32, %arg2: memref<128x128xbf16, #tpu.memory_space<vmem>>, %arg3: memref<128x256xbf16, #tpu.memory_space<vmem>>, %arg4: memref<1x256xf32, #tpu.memory_space<vmem>>, %arg5: memref<256x128xbf16, #tpu.memory_space<vmem>>, %arg6: memref<1x128xf32, #tpu.memory_space<vmem>>, %arg7: memref<128x128xbf16, #tpu.memory_space<vmem>>, %arg8: memref<128x128xf32, #tpu.memory_space<vmem>>) attributes {dimension_semantics = [#tpu.dimension_semantics<parallel>, #tpu.dimension_semantics<arbitrary>], iteration_bounds = array<i64: 4, 2>, scalar_prefetch = 0 : i64, scratch_operands = 1 : i64, tpu.core_type = #tpu.core_type<tc>, window_params = [{transform_indices = @transform_0, window_bounds = array<i64: 128, 128>}, {transform_indices = @transform_1, window_bounds = array<i64: 128, 256>}, {transform_indices = @transform_2, window_bounds = array<i64: 1, 256>}, {transform_indices = @transform_3, window_bounds = array<i64: 256, 128>}, {pipeline_mode = #tpu.pipeline_mode<synchronous>, transform_indices = @transform_4, window_bounds = array<i64: 1, 128>}, {transform_indices = @transform_5, window_bounds = array<i64: 128, 128>}]} {
    %c0_i32 = arith.constant 0 : i32
    %0 = arith.cmpi eq, %arg1, %c0_i32 : i32
    %1 = arith.extui %0 : i1 to i32
    %c0_i32_0 = arith.constant 0 : i32
    %2 = arith.cmpi ne, %1, %c0_i32_0 : i32
    scf.if %2 {
      %cst_17 = arith.constant 0.000000e+00 : f32
      %26 = vector.broadcast %cst_17 : f32 to vector<128x128xf32>
      %c0_18 = arith.constant 0 : index
      %c0_19 = arith.constant 0 : index
      %27 = vector.load %arg8[%c0_18, %c0_19] : memref<128x128xf32, #tpu.memory_space<vmem>>, vector<128x128xf32>
      tpu.vector_store %arg8[%c0_18, %c0_19], %26 {strides = array<i32>} : memref<128x128xf32, #tpu.memory_space<vmem>>, vector<128x128xf32>,
    } else {
    }
    %c0 = arith.constant 0 : index
    %c0_1 = arith.constant 0 : index
    %3 = vector.load %arg2[%c0, %c0_1] : memref<128x128xbf16, #tpu.memory_space<vmem>>, vector<128x128xbf16>
    %c0_2 = arith.constant 0 : index
    %c0_3 = arith.constant 0 : index
    %4 = vector.load %arg3[%c0_2, %c0_3] : memref<128x256xbf16, #tpu.memory_space<vmem>>, vector<128x256xbf16>
    %cst = arith.constant dense<0.000000e+00> : vector<128x256xf32>
    %5 = tpu.matmul %3, %4, %cst {dimension_numbers = #tpu.dot_dimension_numbers<[1], [0], [0], [1], [0, 0, 1, 1], [], []>} : vector<128x128xbf16>, vector<128x256xbf16>, vector<128x256xf32> -> vector<128x256xf32>
    %c0_4 = arith.constant 0 : index
    %c0_5 = arith.constant 0 : index
    %6 = vector.load %arg4[%c0_4, %c0_5] : memref<1x256xf32, #tpu.memory_space<vmem>>, vector<1x256xf32>
    %7 = vector.broadcast %6 : vector<1x256xf32> to vector<128x256xf32>
    %8 = arith.addf %5, %7 : vector<128x256xf32>
    %cst_6 = arith.constant 5.000000e-01 : f32
    %9 = vector.broadcast %cst_6 : f32 to vector<128x256xf32>
    %10 = arith.mulf %9, %8 : vector<128x256xf32>
    %cst_7 = arith.constant 0.707106769 : f32
    %11 = vector.broadcast %cst_7 : f32 to vector<128x256xf32>
    %12 = arith.mulf %8, %11 : vector<128x256xf32>
    %13 = math.erf %12 : vector<128x256xf32>
    %cst_8 = arith.constant 1.000000e+00 : f32
    %14 = vector.broadcast %cst_8 : f32 to vector<128x256xf32>
    %15 = arith.addf %14, %13 : vector<128x256xf32>
    %16 = arith.mulf %10, %15 : vector<128x256xf32>
    %17 = arith.truncf %16 : vector<128x256xf32> to vector<128x256xbf16>
    %c0_9 = arith.constant 0 : index
    %c0_10 = arith.constant 0 : index
    %18 = vector.load %arg8[%c0_9, %c0_10] : memref<128x128xf32, #tpu.memory_space<vmem>>, vector<128x128xf32>
    %c0_11 = arith.constant 0 : index
    %c0_12 = arith.constant 0 : index
    %19 = vector.load %arg5[%c0_11, %c0_12] : memref<256x128xbf16, #tpu.memory_space<vmem>>, vector<256x128xbf16>
    %cst_13 = arith.constant dense<0.000000e+00> : vector<128x128xf32>
    %20 = tpu.matmul %17, %19, %cst_13 {dimension_numbers = #tpu.dot_dimension_numbers<[1], [0], [0], [1], [0, 0, 1, 1], [], []>} : vector<128x256xbf16>, vector<256x128xbf16>, vector<128x128xf32> -> vector<128x128xf32>
    %21 = arith.addf %18, %20 : vector<128x128xf32>
    %c0_14 = arith.constant 0 : index
    %c0_15 = arith.constant 0 : index
    %22 = vector.load %arg8[%c0_14, %c0_15] : memref<128x128xf32, #tpu.memory_space<vmem>>, vector<128x128xf32>
    tpu.vector_store %arg8[%c0_14, %c0_15], %21 {strides = array<i32>} : memref<128x128xf32, #tpu.memory_space<vmem>>, vector<128x128xf32>,
    %c1_i32 = arith.constant 1 : i32
    %23 = arith.cmpi eq, %arg1, %c1_i32 : i32
    %24 = arith.extui %23 : i1 to i32
    %c0_i32_16 = arith.constant 0 : i32
    %25 = arith.cmpi ne, %24, %c0_i32_16 : i32
    scf.if %25 {
      %c0_17 = arith.constant 0 : index
      %c0_18 = arith.constant 0 : index
      %26 = vector.load %arg8[%c0_17, %c0_18] : memref<128x128xf32, #tpu.memory_space<vmem>>, vector<128x128xf32>
      %c0_19 = arith.constant 0 : index
      %c0_20 = arith.constant 0 : index
      %27 = vector.load %arg6[%c0_19, %c0_20] : memref<1x128xf32, #tpu.memory_space<vmem>>, vector<1x128xf32>
      %28 = vector.broadcast %27 : vector<1x128xf32> to vector<128x128xf32>
      %29 = arith.addf %26, %28 : vector<128x128xf32>
      %30 = arith.truncf %29 : vector<128x128xf32> to vector<128x128xbf16>
      %c0_21 = arith.constant 0 : index
      %c0_22 = arith.constant 0 : index
      %31 = vector.load %arg7[%c0_21, %c0_22] : memref<128x128xbf16, #tpu.memory_space<vmem>>, vector<128x128xbf16>
      tpu.vector_store %arg7[%c0_21, %c0_22], %30 {strides = array<i32>} : memref<128x128xbf16, #tpu.memory_space<vmem>>, vector<128x128xbf16>,
    } else {
    }
    return
  }
  func.func @transform_0(%arg0: i32, %arg1: i32) -> (i32, i32) {
    %c0_i32 = arith.constant 0 : i32
    %c0_i32_0 = arith.constant 0 : i32
    return %arg0, %c0_i32 : i32, i32
  }
  func.func @transform_1(%arg0: i32, %arg1: i32) -> (i32, i32) {
    %c0_i32 = arith.constant 0 : i32
    %c0_i32_0 = arith.constant 0 : i32
    return %c0_i32, %arg1 : i32, i32
  }
  func.func @transform_2(%arg0: i32, %arg1: i32) -> (i32, i32) {
    %c0_i32 = arith.constant 0 : i32
    %c0_i32_0 = arith.constant 0 : i32
    return %c0_i32, %arg1 : i32, i32
  }
  func.func @transform_3(%arg0: i32, %arg1: i32) -> (i32, i32) {
    %c0_i32 = arith.constant 0 : i32
    %c0_i32_0 = arith.constant 0 : i32
    return %arg1, %c0_i32 : i32, i32
  }
  func.func @transform_4(%arg0: i32, %arg1: i32) -> (i32, i32) {
    %c0_i32 = arith.constant 0 : i32
    %c0_i32_0 = arith.constant 0 : i32
    %c0_i32_1 = arith.constant 0 : i32
    return %c0_i32, %c0_i32_0 : i32, i32
  }
  func.func @transform_5(%arg0: i32, %arg1: i32) -> (i32, i32) {
    %c0_i32 = arith.constant 0 : i32
    %c0_i32_0 = arith.constant 0 : i32
    return %arg0, %c0_i32 : i32, i32
  }
}

</mosaic_0001>

<bundles_post_ra>
// kernel: mlp_forward.1
= control target key start
LH: loop header
LB: loop body
LE: loop exit
PB: predicated region body
PF: predicated region fallthrough
CT: control target
= control target key end

     0   :  { %s2613_s0 = inlined_call_operand.hbm [shape: bf16[512,128], index: 0, kind: input, shape index: {}]   ;;  %s2614_s1 = inlined_call_operand.hbm [shape: bf16[128,512], index: 1, kind: input, shape index: {}]   ;;  %s2615_s2 = inlined_call_operand.vmem [shape: f32[1,512], index: 2, kind: input, shape index: {}]   ;;  %s2616_s3 = inlined_call_operand.hbm [shape: bf16[512,128], index: 3, kind: input, shape index: {}]   ;;  %s2617_s4 = inlined_call_operand.vmem [shape: f32[1,128], index: 4, kind: input, shape index: {}]   ;;  %s2618_s5 = inlined_call_operand.hbm [shape: bf16[512,128], index: 5, kind: output, shape index: {}]  }
   0x1   :  { %2631 = sst [smem:[#allocation21_spill]] %s2614_s1 }
   0x2   :  { %2632 = sst [smem:[#allocation22_spill]] %s2617_s4 }
   0x3   :  { %2633 = sst [smem:[#allocation23_spill]] %s2618_s5 }
   0x4   :  { %10 = vsyncpa [#allocation4], 0 }
   0x5   :  { %12 = vsyncpa [#allocation4 + $0x1], 0 }
   0x6   :  { %13 = vsyncpa [#allocation7], 0 }
   0x7   :  { %15 = vsyncpa [#allocation7 + $0x1], 0 }
   0x8   :  { %16 = vsyncpa [#allocation5], 0 }
   0x9   :  { %18 = vsyncpa [#allocation5 + $0x1], 0  ;;  %s2091_s18 = smov 0   ;;  %s2093_s19 = smov 0  }
   0xa   :  { %s2095_s20 = smov 0   ;;  %s2097_s21 = smov 0  }
   0xb   :  { %s2099_s22 = smov 0   ;;  %s2101_s23 = smov 0  }
   0xc   :  { %s2103_s24 = smov 0   ;;  %s2105_s25 = smov 0  }
   0xd   :  { %s2107_s26 = smov 0   ;;  %s2109_s27 = smov 0  }
   0xe   :  { %s2111_s28 = smov 0  }
   0xf LB: > { %2634 = sst [smem:[#allocation13_spill]] %s2014_s20  ;;  %s33_s29 = sadd.s32 1, %s2038_s26  ;;  %s2046_s28 = sphi %s2111_s28, %s24_s28   ;;  %s2042_s27 = sphi %s2109_s27, %s2672_s27   ;;  %s2038_s26 = sphi %s2107_s26, %s2678_s26   ;;  %s2034_s25 = sphi %s2105_s25, %s2670_s25   ;;  %s2030_s24 = sphi %s2103_s24, %s2677_s24   ;;  %s2026_s23 = sphi %s2101_s23, %s2669_s23   ;;  %s2022_s22 = sphi %s2099_s22, %s2676_s22   ;;  %s2018_s21 = sphi %s2097_s21, %s2675_s21   ;;  %s2014_s20 = sphi %s2095_s20, %s2667_s20   ;;  %s2010_s19 = sphi %s2093_s19, %s2674_s19   ;;  %s2006_s18 = sphi %s2091_s18, %s2673_s18  }
  0x10   : > { %2635 = sst [smem:[#allocation14_spill]] %s2026_s23  ;;  %p2621_p0 = scmp.eq.s32.totalorder %s2046_s28, 0 }
  0x11   : > { %2636 = sst [smem:[#allocation15_spill]] %s2034_s25  ;;  %p2148_p1 = scmp.ge.s32.totalorder %s33_s29, 2 }
  0x12   : > { %2637 = sst [smem:[#allocation16_spill]] %s2042_s27  ;;  %s69_s6 = sadd.s32 1, %s2014_s20 }
  0x13   : > { %p76_p2 = scmp.ne.s32.totalorder %s2014_s20, %s2010_s19  ;;  %s2680_s29 = smov (%p2148_p1, %s33_s29), 0 }
  0x14   : > { %2639 = sst [smem:[#allocation17_spill]] %s2680_s29  ;;  %s66_s7 = ssub.s32 %s2038_s26, %s2680_s29 }
  0x15   : > { %p78_p4 = por %p76_p2, %p2621_p0  ;;  %p2620_p5 = scmp.lt.s32.totalorder %s2046_s28, 8 }
  0x16   : > { %p67_p6 = scmp.eq.s32.totalorder %s66_s7, 0  ;;  %s229_s8 = sand.u32 1, %s2046_s28  }
  0x17   : > { %s231_s9 = sand.u32 1, %s2014_s20   ;;  %s1467_s12 = sshll.u32 %s2038_s26, 7 }
  0x18   : > { %s2169_s10 = scalar_select %p67_p6, %s2014_s20, %s69_s6  }
  0x19   : > { %s2171_s11 = sshll.u32 %s231_s9, 7  ;;  %s2641_s1 = sld [smem:[#allocation21_spill]] }
  0x1a   : > { %2640 = sst [smem:[#allocation18_spill]] %s2169_s10  ;;  %s233_s16 = scalar_lea.vmem [#allocation6], %s2171_s11 }
  0x1b   : > { %s240_s17 = sshll.u32 %s233_s16, 4  ;;  %p2182_p7 = pnand %p2620_p5, %p78_p4  ;;  %s2186_s17 = int_to_ptr.vmem [resolvable:$true] %s240_s17 }
  0x1c   : > { %s2189_s6 = scalar_lea.sflag [#allocation7], %s229_s8 }
  0x1d   : > { %p2622_p10 = pneg %p2182_p7 }
  0x1f   : > { %s2177_s15 = scalar_lea.hbm %s2641_s1, %s1467_s12  ;;  %s1835_s14 = scalar_lea.hbm %s2641_s1, 4096 }
  0x20   : > { %s1830_s9 = scalar_lea.hbm %s2177_s15, 2048  ;;  %p1836_p13 = scmp.lt.u32.totalorder %s2177_s15, %s2641_s1 }
  0x21   : > { %p1831_p9 = scmp.ne.s32.totalorder %s2177_s15, %s1830_s9  ;;  %p1837_p2 = scmp.lt.u32.totalorder %s1835_s14, %s1830_s9 }
  0x22   : > { %p1839_p6 = scmp.lt.u32.totalorder %s1830_s9, %s2177_s15 }
  0x23   : > { %p1833_p11 = pnand %p2622_p10, %p1831_p9  ;;  %p1838_p4 = por %p1837_p2, %p1836_p13 }
  0x25   : > { %p1834_p12 = pneg %p1833_p11  ;;  %p1840_p5 = por %p1839_p6, %p1838_p4 }
  0x27   : > { %p1841_p3 = pnand %p1840_p5, %p1834_p12 }
  0x29   : > { %1844 = shalt.err (!%p1841_p3)
}
  0x2a   : > { %s1845_s8 = scalar_lea.vmem %s2186_s17, 2048  ;;  %s2048_s12 = smov [#allocation6]  }
  0x2b   : > { %p1846_p9 = scmp.ne.s32.totalorder %s2186_s17, %s1845_s8  ;;  %s1850_s13 = sshll.u32 %s2048_s12, 4  ;;  %s1851_s13 = int_to_ptr.vmem [resolvable:$false] %s1850_s13 }
  0x2c   : > { %s1852_s29 = scalar_lea.vmem %s1851_s13, 4096  ;;  %p1853_p8 = scmp.lt.s32.totalorder %s2186_s17, %s1851_s13 }
  0x2d   : > { %p1848_p11 = pnand %p1846_p9, %p2622_p10  ;;  %p1854_p13 = scmp.lt.s32.totalorder %s1852_s29, %s1845_s8 }
  0x2f   : > { %p1849_p0 = pneg %p1848_p11  ;;  %p1855_p2 = por %p1854_p13, %p1853_p8 }
  0x31   : > { %p1856_p4 = pnand %p1855_p2, %p1849_p0 }
  0x33   : > { %1859 = shalt.err (!%p1856_p4)
}
  0x34   : > { %s2049_s9 = smov 256   ;;  %s2050_s14 = smov 128  }
  0x35   : > { %s2051_s16 = smov 8   ;;  %p277_p0 = scmp.lt.s32.totalorder %s2046_s28, 9 }
  0x36   : > { %1611 = dma.hbm_to_vmem [thread:$0]  (!%p2182_p7), %s2177_s15, 2048, %s2186_s17, %s2189_s6, %s2049_s9, %s2050_s14, %s2051_s16  }
  0x37   : > { %p2643_p3 = scmp.ge.s32.totalorder %s2046_s28, 1  ;;  %s2225_s12 = sadd.s32 4294967295, %s2046_s28  }
  0x38   : > { %s1384_s13 = sadd.s32 4294967294, %s2046_s28   ;;  %s36_s29 = sadd.s32 1, %s2042_s27 }
  0x39   : > { %p2220_p5 = pnand %p2643_p3, %p277_p0  ;;  %s43_s1 = sadd.s32 1, %s2026_s23 }
  0x3a   : > { %s2682_s29 = smov (!%p2148_p1, %s36_s29), %s2042_s27  ;;  %p50_p8 = scmp.ne.s32.totalorder %s2026_s23, %s2022_s22 }
  0x3b   : > { %s2644_s8 = scalar_select %p2220_p5, 1, 0 }
  0x3c   : > { %p56_p12 = scmp.ne.s32.totalorder %s2022_s22, %s2018_s21  ;;  %p38_p6 = scmp.ge.s32.totalorder %s2682_s29, 4 }
  0x3d   : > { %p57_p9 = scmp.eq.s32.totalorder %s2225_s12, 0  ;;  %p2645_p11 = scmp.eq.s32.totalorder %s2046_s28, 0 }
  0x3e   : > { %p179_p2 = scmp.eq.s32.totalorder %s2225_s12, 7  ;;  %s2684_s29 = smov (%p38_p6, %s2682_s29), 0 }
  0x3f   : > { %p2240_p13 = por %p2645_p11, %p50_p8  ;;  %2647 = sst [smem:[#allocation19_spill]] %s2684_s29 }
  0x40   : > { %p2250_p1 = por %p57_p9, %p56_p12  ;;  %p2649_p4 = scmp.ne.s32.totalorder %s2010_s19, %s2006_s18 }
  0x41   : > { %s40_s9 = ssub.s32 %s2042_s27, %s2684_s29  ;;  %p2263_p3 = por %p179_p2, %p50_p8 }
  0x42   : > { %s2648_s30 = scalar_select %p2250_p1, 1, 0 }
  0x43   : > { %p2257_p0 = por %p2649_p4, %p57_p9  ;;  %p41_p11 = scmp.eq.s32.totalorder %s40_s9, 0 }
  0x44   : > { %s2651_s14 = scalar_select %p2263_p3, 1, 0 }
  0x45   : > { %s2650_s17 = scalar_select %p2257_p0, 1, 0 }
  0x46   : > { %p185_p10 = scmp.eq.s32.totalorder %s1384_s13, 7  ;;  %s208_s16 = sand.u32 1, %s2026_s23  }
  0x47   : > { %s1466_s10 = sshll.u32 %s2042_s27, 10  ;;  %s1387_s18 = sshll.u32 %s208_s16, 6 }
  0x48   : > { %s2270_s20 = scalar_select %p41_p11, %s2026_s23, %s43_s1  }
  0x49   : > { %p2275_p6 = por %p185_p10, %p56_p12  ;;  %s2282_s29 = scalar_lea.hbm %s2613_s0, %s1466_s10 }
  0x4a   : > { %2652 = sst [smem:[#allocation20_spill]] %s2270_s20  ;;  %p2654_p8 = scmp.lt.s32.totalorder %s2046_s28, 8 }
  0x4b   : > { %s2653_s5 = scalar_select %p2275_p6, 1, 0 }
  0x4c   : > { %p2288_p9 = pnand %p2654_p8, %p2240_p13  ;;  %s212_s13 = scalar_lea.vmem [#allocation3], %s1387_s18 }
  0x4d   : > { %s219_s9 = sshll.u32 %s212_s13, 4  ;;  %s2294_s27 = scalar_lea.sflag [#allocation4], %s208_s16  ;;  %s2292_s9 = int_to_ptr.vmem [resolvable:$true] %s219_s9 }
  0x4e   : > { %s1860_s4 = scalar_lea.hbm %s2282_s29, 1024  ;;  %p1862_p12 = pneg %p2288_p9 }
  0x4f   : > { %p1861_p10 = scmp.ne.s32.totalorder %s2282_s29, %s1860_s4  ;;  %s1865_s15 = scalar_lea.hbm %s2613_s0, 4096 }
  0x50   : > { %p1866_p13 = scmp.lt.u32.totalorder %s2282_s29, %s2613_s0  ;;  %p1867_p11 = scmp.lt.u32.totalorder %s1865_s15, %s1860_s4 }
  0x51   : > { %p1863_p2 = pnand %p1862_p12, %p1861_p10  ;;  %p1869_p6 = scmp.lt.u32.totalorder %s1860_s4, %s2282_s29 }
  0x52   : > { %p1868_p8 = por %p1867_p11, %p1866_p13 }
  0x53   : > { %p1864_p4 = pneg %p1863_p2 }
  0x54   : > { %p1870_p3 = por %p1869_p6, %p1868_p8 }
  0x56   : > { %p1871_p0 = pnand %p1870_p3, %p1864_p4 }
  0x58   : > { %1874 = shalt.err (!%p1871_p0)
}
  0x59   : > { %s1875_s16 = scalar_lea.vmem %s2292_s9, 1024  ;;  %s2052_s18 = smov [#allocation3]  }
  0x5a   : > { %p1876_p10 = scmp.ne.s32.totalorder %s2292_s9, %s1875_s16  ;;  %s1880_s13 = sshll.u32 %s2052_s18, 4  ;;  %s1881_s13 = int_to_ptr.vmem [resolvable:$false] %s1880_s13 }
  0x5b   : > { %s1882_s20 = scalar_lea.vmem %s1881_s13, 2048  ;;  %p1883_p5 = scmp.lt.s32.totalorder %s2292_s9, %s1881_s13 }
  0x5c   : > { %p1878_p2 = pnand %p1876_p10, %p1862_p12  ;;  %p1884_p13 = scmp.lt.s32.totalorder %s1882_s20, %s1875_s16 }
  0x5e   : > { %p1879_p1 = pneg %p1878_p2  ;;  %p1885_p11 = por %p1884_p13, %p1883_p5 }
  0x60   : > { %p1886_p6 = pnand %p1885_p11, %p1879_p1 }
  0x62   : > { %1889 = shalt.err (!%p1886_p6)
}
  0x63   : > { %s2053_s23 = smov 64   ;;  %s2054_s4 = smov 4  }
  0x64   : > { %1608 = dma.hbm_to_vmem [thread:$0]  (!%p2288_p9), %s2282_s29, 1024, %s2292_s9, %s2294_s27, %s2053_s23, %s2053_s23, %s2054_s4  }
  0x65   : > { %s1468_s25 = sshll.u32 %s2038_s26, 11  ;;  %s262_s10 = scalar_lea.vmem [#allocation8], %s2171_s11 }
  0x66   : > { %s269_s15 = sshll.u32 %s262_s10, 4  ;;  %s2330_s13 = scalar_lea.hbm %s2616_s3, %s1468_s25  ;;  %s2332_s15 = int_to_ptr.vmem [resolvable:$true] %s269_s15 }
  0x67   : > { %s1890_s20 = scalar_lea.hbm %s2330_s13, 2048  ;;  %p2656_p1 = pneg %p2182_p7 }
  0x68   : > { %p1891_p5 = scmp.ne.s32.totalorder %s2330_s13, %s1890_s20  ;;  %s1895_s29 = scalar_lea.hbm %s2616_s3, 4096 }
  0x69   : > { %p1896_p9 = scmp.lt.u32.totalorder %s2330_s13, %s2616_s3  ;;  %p1897_p12 = scmp.lt.u32.totalorder %s1895_s29, %s1890_s20 }
  0x6a   : > { %p1893_p0 = pnand %p1891_p5, %p2656_p1  ;;  %p1899_p8 = scmp.lt.u32.totalorder %s1890_s20, %s2330_s13 }
  0x6b   : > { %p1898_p4 = por %p1897_p12, %p1896_p9 }
  0x6c   : > { %p1894_p3 = pneg %p1893_p0 }
  0x6d   : > { %p1900_p10 = por %p1899_p8, %p1898_p4 }
  0x6f   : > { %p1901_p2 = pnand %p1900_p10, %p1894_p3 }
  0x71   : > { %1904 = shalt.err (!%p1901_p2)
}
  0x72   : > { %s1905_s25 = scalar_lea.vmem %s2332_s15, 2048  ;;  %p2657_p11 = pmov %p2656_p1 }
  0x73   : > { %p1906_p13 = scmp.ne.s32.totalorder %s2332_s15, %s1905_s25  ;;  %s2055_s10 = smov [#allocation8]  }
  0x74   : > { %s1910_s16 = sshll.u32 %s2055_s10, 4  ;;  %s1911_s16 = int_to_ptr.vmem [resolvable:$false] %s1910_s16 }
  0x75   : > { %p1908_p6 = pnand %p1906_p13, %p2657_p11  ;;  %s1912_s18 = scalar_lea.vmem %s1911_s16, 4096 }
  0x76   : > { %p1913_p1 = scmp.lt.s32.totalorder %s2332_s15, %s1911_s16  ;;  %p1914_p0 = scmp.lt.s32.totalorder %s1912_s18, %s1905_s25 }
  0x77   : > { %p1909_p5 = pneg %p1908_p6 }
  0x78   : > { %p1915_p9 = por %p1914_p0, %p1913_p1 }
  0x7a   : > { %p1916_p12 = pnand %p1915_p9, %p1909_p5 }
  0x7c   : > { %1919 = shalt.err (!%p1916_p12)
}
  0x7d   : > { %1614 = dma.hbm_to_vmem [thread:$0]  (!%p2182_p7), %s2330_s13, 2048, %s2332_s15, %s2189_s6, %s2053_s23, %s2053_s23, %s2054_s4  }
  0x7e   : > { %p2658_p3 = scmp.ne.s32.totalorder %s2644_s8, 0 }
  0x7f   : > { %s2364_s20 = sand.u32 (!%p2658_p3), 1, %s2022_s22   ;;  %p2659_p4 = scmp.ne.s32.totalorder (!%p2658_p3), %s2648_s30, 0 }
  0x80   : > { %281 = sbr.rel (%p2658_p3) target bundleno = 739 (0x2e3), region = 40  ;;  %s1397_s27 = sshll.u32 (!%p2658_p3), %s2364_s20, 6 }
  0x81   : > { %s284_s11 = scalar_lea.sflag (!%p2658_p3), [#allocation4], %s2364_s20  ;;  %s2368_s29 = scalar_lea.vmem (!%p2658_p3), [#allocation3], %s1397_s27 }
  0x87   : > { %1993 = dma.done.wait (%p2659_p4), %s284_s11, 1024  }
  0x88   : > { %1995 = vsyncadd (%p2659_p4), %s284_s11, 4294966272  ;;  %s292_s7 = sand.u32 1, %s2225_s12   ;;  %s294_s6 = sand.u32 1, %s2010_s19  }
  0x89   : > { %s1398_s8 = sshll.u32 %s294_s6, 7  ;;  %s293_s23 = scalar_lea.sflag [#allocation7], %s292_s7 }
  0x8a   : > { %s2376_s4 = scalar_lea.vmem [#allocation6], %s1398_s8  ;;  %p2660_p7 = scmp.ne.s32.totalorder %s2650_s17, 0 }
  0x8c   : > { %1997 = dma.done.wait (%p2660_p7), %s293_s23, 4096  }
  0x8d   : > { %1999 = vsyncadd (%p2660_p7), %s293_s23, 4294963200  ;;  %s1401_s15 = sshll.u32 %s2030_s24, 1  ;;  %s2389_s1 = scalar_lea.vmem [#allocation8], %s1398_s8 }
  0x8e   : > { %p349_p8 = scmp.lt.s32.totalorder %s1401_s15, 3  ;;  %s2391_s9 = scalar_lea.vmem [#allocation9], %s1397_s27 }
  0x8f   : > { %p1402_p10 = scmp.ne.s32.totalorder %s2030_s24, 0 }
  0x90   : > { %s2686_s15 = smov (!%p349_p8, %s1401_s15), 3  ;;  %v2056_v0 = vmov (!%p1402_p10), 0.0  }
  0x91   : > { %s351_s12 = scalar_lea.vmem %s2615_s2, %s2686_s15  ;;  %359 = sbr.rel (%p1402_p10) target bundleno = 153 (0x99), region = 56  ;;  %360 = vst [vmem:[#allocation2] sm:$0xff] (!%p1402_p10), %v2056_v0  ;;  %361 = vst [vmem:[#allocation2 + $0x8] sm:$0xff] (!%p1402_p10), %v2056_v0 }
  0x92   : > { %362 = vst [vmem:[#allocation2 + $0x10] sm:$0xff] (!%p1402_p10), %v2056_v0  ;;  %363 = vst [vmem:[#allocation2 + $0x18] sm:$0xff] (!%p1402_p10), %v2056_v0 }
  0x93   : > { %364 = vst [vmem:[#allocation2 + $0x20] sm:$0xff] (!%p1402_p10), %v2056_v0  ;;  %365 = vst [vmem:[#allocation2 + $0x28] sm:$0xff] (!%p1402_p10), %v2056_v0 }
  0x94   : > { %366 = vst [vmem:[#allocation2 + $0x30] sm:$0xff] (!%p1402_p10), %v2056_v0  ;;  %367 = vst [vmem:[#allocation2 + $0x38] sm:$0xff] (!%p1402_p10), %v2056_v0 }
  0x95   : > { %368 = vst [vmem:[#allocation2 + $0x40] sm:$0xff] (!%p1402_p10), %v2056_v0  ;;  %369 = vst [vmem:[#allocation2 + $0x48] sm:$0xff] (!%p1402_p10), %v2056_v0 }
  0x96   : > { %370 = vst [vmem:[#allocation2 + $0x50] sm:$0xff] (!%p1402_p10), %v2056_v0  ;;  %371 = vst [vmem:[#allocation2 + $0x58] sm:$0xff] (!%p1402_p10), %v2056_v0 }
  0x97   : > { %372 = vst [vmem:[#allocation2 + $0x60] sm:$0xff] (!%p1402_p10), %v2056_v0  ;;  %373 = vst [vmem:[#allocation2 + $0x68] sm:$0xff] (!%p1402_p10), %v2056_v0 }
  0x98   : > { %374 = vst [vmem:[#allocation2 + $0x70] sm:$0xff] %v2056_v0  ;;  %375 = vst [vmem:[#allocation2 + $0x78] sm:$0xff] %v2056_v0 }
  0x99 PF: > { %v1718_v1 = vld [vmem:[%s2376_s4 + $0x4] ss:$8 sps:$4 sm:$0xff]   ;;  %v1720_v2 = vld [vmem:[%s2376_s4] ss:$8 sps:$4 sm:$0xff]   ;;  %v2057_v3 = vmov 0   ;;  %v1744_v24 = vld [vmem:[%s2368_s29 + $0x10] sm:$0xff]   ;;  %v410_v42 = vlaneseq }
  0x9a   : > { %580 = vmatprep.mubr.bf16.mxu0 %v2057_v3  ;;  %548 = vmatprep.subr.bf16.mxu0 %v1718_v1  ;;  %v1721_v4 = vld [vmem:[%s2376_s4 + $0x14] ss:$8 sps:$4 sm:$0xff]   ;;  %v1723_v5 = vld [vmem:[%s2376_s4 + $0x10] ss:$8 sps:$4 sm:$0xff]   ;;  %v1724_v6 = vld [vmem:[%s2376_s4 + $0x24] ss:$8 sps:$4 sm:$0xff]  }
  0x9b   : > { %549 = vmatpush1.bf16.msra.mxu0 %v1720_v2  ;;  %v1726_v7 = vld [vmem:[%s2376_s4 + $0x20] ss:$8 sps:$4 sm:$0xff]   ;;  %v1727_v8 = vld [vmem:[%s2376_s4 + $0x34] ss:$8 sps:$4 sm:$0xff]   ;;  %v1729_v9 = vld [vmem:[%s2376_s4 + $0x30] ss:$8 sps:$4 sm:$0xff]  }
  0x9c   : > { %550 = vmatprep.subr.bf16.mxu0 %v1721_v4  ;;  %v1730_v10 = vld [vmem:[%s2376_s4 + $0x44] ss:$8 sps:$4 sm:$0xff]   ;;  %v1732_v11 = vld [vmem:[%s2376_s4 + $0x40] ss:$8 sps:$4 sm:$0xff]   ;;  %v1733_v12 = vld [vmem:[%s2376_s4 + $0x54] ss:$8 sps:$4 sm:$0xff]  }
  0x9d   : > { %v1735_v13 = vld [vmem:[%s2376_s4 + $0x50] ss:$8 sps:$4 sm:$0xff]   ;;  %v1736_v14 = vld [vmem:[%s2376_s4 + $0x64] ss:$8 sps:$4 sm:$0xff]   ;;  %v1738_v17 = vld [vmem:[%s2376_s4 + $0x60] ss:$8 sps:$4 sm:$0xff]  }
  0x9e   : > { %v1750_v15 = vld [vmem:[%s2389_s1 + $0x40] sm:$0xff]   ;;  %v1752_v18 = vld [vmem:[%s2389_s1 + $0x48] sm:$0xff]   ;;  %v1739_v19 = vld [vmem:[%s2376_s4 + $0x74] ss:$8 sps:$4 sm:$0xff]   ;;  %v411_v43 = vshrl.u32 %v410_v42, 7  ;;  %p1443_p2 = scmp.ne.s32.totalorder %s2030_s24, 1 }
  0x9f   : > { %551 = vmatpush1.bf16.msra.mxu0 %v1723_v5  ;;  %v1751_v16 = vld [vmem:[%s2389_s1] sm:$0xff]   ;;  %1533 = vmatprep.subr.bf16.mxu1 %v1750_v15  ;;  %v1753_v20 = vld [vmem:[%s2389_s1 + $0x8] sm:$0xff]   ;;  %v1741_v21 = vld [vmem:[%s2376_s4 + $0x70] ss:$8 sps:$4 sm:$0xff]   ;;  %s2661_s18 = sld [smem:[#allocation22_spill]] (!%p1443_p2) }
  0xa0   : > { %552 = vmatprep.subr.bf16.mxu0 %v1724_v6  ;;  %1534 = vmatpush3.bf16.msra.mxu1 %v1751_v16  ;;  %v1742_v22 = vld [vmem:[%s2368_s29] sm:$0xff]   ;;  %v1743_v23 = vld [vmem:[%s2368_s29 + $0x8] sm:$0xff]   ;;  %v1745_v25 = vld [vmem:[%s2368_s29 + $0x18] sm:$0xff]   ;;  %v412_v44 = vsub.s32 0, %v411_v43  ;;  %v416_v46 = vsub.s32 1, %v411_v43 }
  0xa1   : > { %1535 = vmatprep.subr.bf16.mxu1 %v1752_v18  ;;  %v1746_v26 = vld [vmem:[%s2368_s29 + $0x20] sm:$0xff]   ;;  %v1747_v27 = vld [vmem:[%s2368_s29 + $0x28] sm:$0xff]   ;;  %v1748_v28 = vld [vmem:[%s2368_s29 + $0x30] sm:$0xff]  }
  0xa2   : > { %v1749_v29 = vld [vmem:[%s2368_s29 + $0x38] sm:$0xff]   ;;  %v1754_v30 = vld [vmem:[%s2389_s1 + $0x50] sm:$0xff]   ;;  %v1758_v34 = vld [vmem:[%s2389_s1 + $0x60] sm:$0xff]  }
  0xa3   : > { %553 = vmatpush1.bf16.msra.mxu0 %v1726_v7  ;;  %v1755_v31 = vld [vmem:[%s2389_s1 + $0x10] sm:$0xff]   ;;  %v1756_v32 = vld [vmem:[%s2389_s1 + $0x58] sm:$0xff]   ;;  %v1759_v35 = vld [vmem:[%s2389_s1 + $0x20] sm:$0xff]  }
  0xa4   : > { %554 = vmatprep.subr.bf16.mxu0 %v1727_v8  ;;  %1536 = vmatpush3.bf16.msra.mxu1 %v1753_v20  ;;  %v1757_v33 = vld [vmem:[%s2389_s1 + $0x18] sm:$0xff]   ;;  %v1760_v36 = vld [vmem:[%s2389_s1 + $0x68] sm:$0xff]   ;;  %v1762_v38 = vld [vmem:[%s2389_s1 + $0x70] sm:$0xff]  }
  0xa5   : > { %1537 = vmatprep.subr.bf16.mxu1 %v1754_v30  ;;  %v1761_v37 = vld [vmem:[%s2389_s1 + $0x28] sm:$0xff]   ;;  %v1763_v39 = vld [vmem:[%s2389_s1 + $0x30] sm:$0xff]   ;;  %v1764_v40 = vld [vmem:[%s2389_s1 + $0x78] sm:$0xff]  }
  0xa6   : > { %v1765_v41 = vld [vmem:[%s2389_s1 + $0x38] sm:$0xff]   ;;  %v408_v45 = vld [vmem:[%s351_s12] sm:$0x3] }
  0xa7   : > { %555 = vmatpush1.bf16.msra.mxu0 %v1729_v9  ;;  %v2439_v47 = vrot.slane %v408_v45, %v412_v44  ;;  %v2441_v48 = vrot.slane %v408_v45, %v416_v46 }
  0xa8   : > { %556 = vmatprep.subr.bf16.mxu0 %v1730_v10  ;;  %1538 = vmatpush3.bf16.msra.mxu1 %v1755_v31 }
  0xa9   : > { %1539 = vmatprep.subr.bf16.mxu1 %v1756_v32 }
  0xab   : > { %557 = vmatpush1.bf16.msra.mxu0 %v1732_v11 }
  0xac   : > { %558 = vmatprep.subr.bf16.mxu0 %v1733_v12  ;;  %1540 = vmatpush3.bf16.msra.mxu1 %v1757_v33 }
  0xad   : > { %1541 = vmatprep.subr.bf16.mxu1 %v1758_v34 }
  0xaf   : > { %559 = vmatpush1.bf16.msra.mxu0 %v1735_v13 }
  0xb0   : > { %560 = vmatprep.subr.bf16.mxu0 %v1736_v14  ;;  %1542 = vmatpush3.bf16.msra.mxu1 %v1759_v35 }
  0xb1   : > { %1543 = vmatprep.subr.bf16.mxu1 %v1760_v36 }
  0xb3   : > { %561 = vmatpush1.bf16.msra.mxu0 %v1738_v17 }
  0xb4   : > { %562 = vmatprep.subr.bf16.mxu0 %v1739_v19  ;;  %1544 = vmatpush3.bf16.msra.mxu1 %v1761_v37 }
  0xb5   : > { %1545 = vmatprep.subr.bf16.mxu1 %v1762_v38 }
  0xb7   : > { %563 = vmatpush1.bf16.msra.mxu0 %v1741_v21 }
  0xb8   : > { %1546 = vmatpush3.bf16.msra.mxu1 %v1763_v39 }
  0xb9   : > { %1547 = vmatprep.subr.bf16.mxu1 %v1764_v40 }
  0xba   : > { %581 = vmatmul.mubr.bf16.vlgmr.msra.gmra.mrb[0].mxu0 %v1742_v22 }
  0xbb   : > { %590 = vmatprep.mubr.bf16.mxu0 %v2057_v3 }
  0xbc   : > { %1548 = vmatpush3.bf16.msra.mxu1 %v1765_v41 }
  0xc2   : > { %591 = vmatmul.mubr.bf16.gmra.mrb[4].mxu0 %v1743_v23 }
  0xc3   : > { %600 = vmatprep.mubr.bf16.mxu0 %v2057_v3 }
  0xca   : > { %601 = vmatmul.mubr.bf16.gmra.mrb[8].mxu0 %v1744_v24 }
  0xcb   : > { %610 = vmatprep.mubr.bf16.mxu0 %v2057_v3 }
  0xd2   : > { %611 = vmatmul.mubr.bf16.gmra.mrb[12].mxu0 %v1745_v25 }
  0xd3   : > { %620 = vmatprep.mubr.bf16.mxu0 %v2057_v3 }
  0xda   : > { %621 = vmatmul.mubr.bf16.gmra.mrb[16].mxu0 %v1746_v26 }
  0xdb   : > { %630 = vmatprep.mubr.bf16.mxu0 %v2057_v3 }
  0xe2   : > { %631 = vmatmul.mubr.bf16.gmra.mrb[20].mxu0 %v1747_v27 }
  0xe3   : > { %640 = vmatprep.mubr.bf16.mxu0 %v2057_v3 }
  0xea   : > { %641 = vmatmul.mubr.bf16.gmra.mrb[24].mxu0 %v1748_v28 }
  0xeb   : > { %650 = vmatprep.mubr.bf16.mxu0 %v2057_v3 }
  0xf2   : > { %651 = vmatmul.mubr.bf16.gmra.mrb[28].mxu0 %v1749_v29 }
 0x18d   : > { %v582_v49 = vpop.f32.mrb[0].mxu0 }
 0x18e   : > { %v583_v50 = vadd.f32 %v582_v49, %v2439_v47  ;;  %v584_v51 = vpop.f32.mrb[1].mxu0 }
 0x18f   : > { %v585_v52 = vadd.f32 %v584_v51, %v2441_v48  ;;  %v586_v53 = vpop.f32.mrb[2].mxu0 }
 0x190   : > { %v693_v54 = vmul.f32 0.70710677, %v583_v50  ;;  %v587_v55 = vadd.f32 %v586_v53, %v2439_v47  ;;  %v588_v56 = vpop.f32.mrb[3].mxu0  ;;  %v661_v13 = vmul.f32 0.5, %v583_v50 }
 0x191   : > { %v694_v57 = vmul.f32 0.70710677, %v585_v52  ;;  %v589_v58 = vadd.f32 %v588_v56, %v2441_v48  ;;  %v662_v23 = vmul.f32 0.5, %v585_v52 }
 0x192   : > { %1766 = verf.f32 %v693_v54  ;;  %v695_v59 = vmul.f32 0.70710677, %v587_v55  ;;  %v663_v18 = vmul.f32 0.5, %v587_v55 }
 0x193   : > { %1768 = verf.f32 %v694_v57  ;;  %v696_v60 = vmul.f32 0.70710677, %v589_v58  ;;  %v664_v29 = vmul.f32 0.5, %v589_v58 }
 0x194   : > { %1770 = verf.f32 %v695_v59 }
 0x195   : > { %1772 = verf.f32 %v696_v60  ;;  %v592_v61 = vpop.f32.mrb[4].mxu0 }
 0x196   : > { %v593_v62 = vadd.f32 %v592_v61, %v2439_v47  ;;  %v594_v63 = vpop.f32.mrb[5].mxu0 }
 0x197   : > { %v595_v0 = vadd.f32 %v594_v63, %v2441_v48  ;;  %v596_v1 = vpop.f32.mrb[6].mxu0 }
 0x198   : > { %v697_v2 = vmul.f32 0.70710677, %v593_v62  ;;  %v597_v3 = vadd.f32 %v596_v1, %v2439_v47  ;;  %v598_v4 = vpop.f32.mrb[7].mxu0  ;;  %v665_v50 = vmul.f32 0.5, %v593_v62 }
 0x199   : > { %v698_v5 = vmul.f32 0.70710677, %v595_v0  ;;  %v599_v6 = vadd.f32 %v598_v4, %v2441_v48  ;;  %v666_v55 = vmul.f32 0.5, %v595_v0 }
 0x19a   : > { %1774 = verf.f32 %v697_v2  ;;  %v699_v7 = vmul.f32 0.70710677, %v597_v3  ;;  %v667_v51 = vmul.f32 0.5, %v597_v3 }
 0x19b   : > { %1776 = verf.f32 %v698_v5  ;;  %v700_v8 = vmul.f32 0.70710677, %v599_v6  ;;  %v668_v56 = vmul.f32 0.5, %v599_v6 }
 0x19c   : > { %v1767_v9 = vpop.eup %1766  ;;  %1778 = verf.f32 %v699_v7 }
 0x19d   : > { %v1769_v10 = vpop.eup %1768  ;;  %1780 = verf.f32 %v700_v8  ;;  %v602_v11 = vpop.f32.mrb[8].mxu0  ;;  %v757_v14 = vadd.f32 1.0, %v1767_v9 }
 0x19e   : > { %v1771_v12 = vpop.eup %1770  ;;  %v2452_v15 = vadd.f32 %v602_v11, %v2439_v47  ;;  %v604_v16 = vpop.f32.mrb[9].mxu0  ;;  %v758_v22 = vadd.f32 1.0, %v1769_v10 }
 0x19f   : > { %v1773_v17 = vpop.eup %1772  ;;  %v759_v19 = vadd.f32 1.0, %v1771_v12  ;;  %v2455_v20 = vadd.f32 %v604_v16, %v2441_v48  ;;  %v606_v21 = vpop.f32.mrb[10].mxu0  ;;  %v789_v32 = vmul.f32 %v757_v14, %v661_v13 }
 0x1a0   : > { %v701_v24 = vmul.f32 0.70710677, %v2452_v15  ;;  %v2459_v25 = vadd.f32 %v606_v21, %v2439_v47  ;;  %v608_v26 = vpop.f32.mrb[11].mxu0  ;;  %v760_v27 = vadd.f32 1.0, %v1773_v17  ;;  %v790_v35 = vmul.f32 %v758_v22, %v662_v23 }
 0x1a1   : > { %v791_v28 = vmul.f32 %v759_v19, %v663_v18  ;;  %v702_v30 = vmul.f32 0.70710677, %v2455_v20  ;;  %v2463_v31 = vadd.f32 %v608_v26, %v2441_v48  ;;  %v669_v17 = vmul.f32 0.5, %v2452_v15 }
 0x1a2   : > { %1782 = verf.f32 %v701_v24  ;;  %v703_v33 = vmul.f32 0.70710677, %v2459_v25  ;;  %v792_v36 = vmul.f32 %v760_v27, %v664_v29  ;;  %v671_v18 = vmul.f32 0.5, %v2459_v25 }
 0x1a3   : > { %1784 = verf.f32 %v702_v30  ;;  %v704_v34 = vmul.f32 0.70710677, %v2463_v31  ;;  %v821_v38 = vpack.c.bf16 %v791_v28, %v789_v32  ;;  %v670_v23 = vmul.f32 0.5, %v2455_v20 }
 0x1a4   : > { %v1775_v37 = vpop.eup %1774  ;;  %1786 = verf.f32 %v703_v33  ;;  %v822_v42 = vpack.c.bf16 %v792_v36, %v790_v35  ;;  %v672_v24 = vmul.f32 0.5, %v2463_v31 }
 0x1a5   : > { %v1777_v39 = vpop.eup %1776  ;;  %v761_v40 = vadd.f32 1.0, %v1775_v37  ;;  %1788 = verf.f32 %v704_v34  ;;  %v612_v41 = vpop.f32.mrb[12].mxu0 }
 0x1a6   : > { %v1779_v43 = vpop.eup %1778  ;;  %v762_v44 = vadd.f32 1.0, %v1777_v39  ;;  %v2468_v45 = vadd.f32 %v612_v41, %v2439_v47  ;;  %v614_v46 = vpop.f32.mrb[13].mxu0  ;;  %1013 = vmatprep.mubr.bf16.mxu1 %v822_v42 }
 0x1a7   : > { %v1781_v49 = vpop.eup %1780  ;;  %v763_v52 = vadd.f32 1.0, %v1779_v43  ;;  %v2471_v53 = vadd.f32 %v614_v46, %v2441_v48  ;;  %v616_v54 = vpop.f32.mrb[14].mxu0  ;;  %1014 = vmatmul.mubr.bf16.vlgmr.msra.gmra.mrb[0].mxu1 %v821_v38  ;;  %v793_v60 = vmul.f32 %v761_v40, %v665_v50 }
 0x1a8   : > { %v764_v57 = vadd.f32 1.0, %v1781_v49  ;;  %v705_v58 = vmul.f32 0.70710677, %v2468_v45  ;;  %v618_v59 = vpop.f32.mrb[15].mxu0  ;;  %v617_v62 = vadd.f32 %v616_v54, %v2439_v47  ;;  %v794_v1 = vmul.f32 %v762_v44, %v666_v55 }
 0x1a9   : > { %v795_v61 = vmul.f32 %v763_v52, %v667_v51  ;;  %v706_v63 = vmul.f32 0.70710677, %v2471_v53  ;;  %v619_v3 = vadd.f32 %v618_v59, %v2441_v48  ;;  %v673_v44 = vmul.f32 0.5, %v2468_v45 }
 0x1aa   : > { %v796_v2 = vmul.f32 %v764_v57, %v668_v56  ;;  %1790 = verf.f32 %v705_v58  ;;  %v707_v4 = vmul.f32 0.70710677, %v617_v62  ;;  %v674_v52 = vmul.f32 0.5, %v2471_v53 }
 0x1ab   : > { %1792 = verf.f32 %v706_v63  ;;  %v823_v0 = vpack.c.bf16 %v795_v61, %v793_v60  ;;  %v708_v6 = vmul.f32 0.70710677, %v619_v3  ;;  %v675_v54 = vmul.f32 0.5, %v617_v62 }
 0x1ac   : > { %v1783_v5 = vpop.eup %1782  ;;  %v824_v7 = vpack.c.bf16 %v796_v2, %v794_v1  ;;  %1794 = verf.f32 %v707_v4  ;;  %v676_v58 = vmul.f32 0.5, %v619_v3 }
 0x1ad   : > { %v1785_v8 = vpop.eup %1784  ;;  %v765_v9 = vadd.f32 1.0, %v1783_v5  ;;  %v622_v10 = vpop.f32.mrb[16].mxu0  ;;  %1796 = verf.f32 %v708_v6 }
 0x1ae   : > { %v1787_v11 = vpop.eup %1786  ;;  %v766_v12 = vadd.f32 1.0, %v1785_v8  ;;  %v2478_v13 = vadd.f32 %v622_v10, %v2439_v47  ;;  %v624_v14 = vpop.f32.mrb[17].mxu0  ;;  %1021 = vmatprep.mubr.bf16.mxu1 %v824_v7 }
 0x1af   : > { %v1789_v16 = vpop.eup %1788  ;;  %v767_v19 = vadd.f32 1.0, %v1787_v11  ;;  %v2483_v21 = vadd.f32 %v624_v14, %v2441_v48  ;;  %v626_v22 = vpop.f32.mrb[18].mxu0  ;;  %1022 = vmatmul.mubr.bf16.gmra.mrb[4].mxu1 %v823_v0  ;;  %v797_v29 = vmul.f32 %v765_v9, %v669_v17 }
 0x1b0   : > { %v768_v26 = vadd.f32 1.0, %v1789_v16  ;;  %v709_v27 = vmul.f32 0.70710677, %v2478_v13  ;;  %v628_v28 = vpop.f32.mrb[19].mxu0  ;;  %v627_v25 = vadd.f32 %v626_v22, %v2439_v47  ;;  %v798_v32 = vmul.f32 %v766_v12, %v670_v23 }
 0x1b1   : > { %v799_v30 = vmul.f32 %v767_v19, %v671_v18  ;;  %v710_v15 = vmul.f32 0.70710677, %v2483_v21  ;;  %v629_v34 = vadd.f32 %v628_v28, %v2441_v48  ;;  %v677_v12 = vmul.f32 0.5, %v2478_v13 }
 0x1b2   : > { %v800_v33 = vmul.f32 %v768_v26, %v672_v24  ;;  %1798 = verf.f32 %v709_v27  ;;  %v711_v20 = vmul.f32 0.70710677, %v627_v25  ;;  %v678_v19 = vmul.f32 0.5, %v2483_v21 }
 0x1b3   : > { %1800 = verf.f32 %v710_v15  ;;  %v825_v35 = vpack.c.bf16 %v799_v30, %v797_v29  ;;  %v712_v36 = vmul.f32 0.70710677, %v629_v34  ;;  %v679_v22 = vmul.f32 0.5, %v627_v25 }
 0x1b4   : > { %v1791_v31 = vpop.eup %1790  ;;  %v826_v37 = vpack.c.bf16 %v800_v33, %v798_v32  ;;  %1802 = verf.f32 %v711_v20  ;;  %v680_v27 = vmul.f32 0.5, %v629_v34 }
 0x1b5   : > { %v1793_v38 = vpop.eup %1792  ;;  %v632_v39 = vpop.f32.mrb[20].mxu0  ;;  %v769_v40 = vadd.f32 1.0, %v1791_v31  ;;  %1804 = verf.f32 %v712_v36 }
 0x1b6   : > { %v2492_v41 = vadd.f32 %v632_v39, %v2439_v47  ;;  %v634_v42 = vpop.f32.mrb[21].mxu0  ;;  %1029 = vmatprep.mubr.bf16.mxu1 %v826_v37  ;;  %v1795_v43 = vpop.eup %1794  ;;  %v770_v46 = vadd.f32 1.0, %v1793_v38 }
 0x1b7   : > { %v2496_v49 = vadd.f32 %v634_v42, %v2441_v48  ;;  %v636_v50 = vpop.f32.mrb[22].mxu0  ;;  %v1797_v51 = vpop.eup %1796  ;;  %v771_v55 = vadd.f32 1.0, %v1795_v43  ;;  %1030 = vmatmul.mubr.bf16.gmra.mrb[8].mxu1 %v825_v35  ;;  %v801_v61 = vmul.f32 %v769_v40, %v673_v44 }
 0x1b8   : > { %v713_v56 = vmul.f32 0.70710677, %v2492_v41  ;;  %v638_v57 = vpop.f32.mrb[23].mxu0  ;;  %v772_v59 = vadd.f32 1.0, %v1797_v51  ;;  %v2502_v45 = vadd.f32 %v636_v50, %v2439_v47  ;;  %v802_v53 = vmul.f32 %v770_v46, %v674_v52 }
 0x1b9   : > { %v714_v60 = vmul.f32 0.70710677, %v2496_v49  ;;  %v803_v63 = vmul.f32 %v771_v55, %v675_v54  ;;  %v2505_v1 = vadd.f32 %v638_v57, %v2441_v48  ;;  %v681_v43 = vmul.f32 0.5, %v2492_v41 }
 0x1ba   : > { %1806 = verf.f32 %v713_v56  ;;  %v804_v62 = vmul.f32 %v772_v59, %v676_v58  ;;  %v715_v2 = vmul.f32 0.70710677, %v2502_v45  ;;  %v682_v52 = vmul.f32 0.5, %v2496_v49 }
 0x1bb   : > { %1808 = verf.f32 %v714_v60  ;;  %v716_v3 = vmul.f32 0.70710677, %v2505_v1  ;;  %v827_v0 = vpack.c.bf16 %v803_v63, %v801_v61  ;;  %v683_v54 = vmul.f32 0.5, %v2502_v45 }
 0x1bc   : > { %v1799_v4 = vpop.eup %1798  ;;  %1810 = verf.f32 %v715_v2  ;;  %v828_v7 = vpack.c.bf16 %v804_v62, %v802_v53  ;;  %v684_v58 = vmul.f32 0.5, %v2505_v1 }
 0x1bd   : > { %v1801_v5 = vpop.eup %1800  ;;  %v642_v6 = vpop.f32.mrb[24].mxu0  ;;  %v773_v8 = vadd.f32 1.0, %v1799_v4  ;;  %1812 = verf.f32 %v716_v3 }
 0x1be   : > { %v2510_v9 = vadd.f32 %v642_v6, %v2439_v47  ;;  %v644_v10 = vpop.f32.mrb[25].mxu0  ;;  %v1803_v11 = vpop.eup %1802  ;;  %v774_v14 = vadd.f32 1.0, %v1801_v5  ;;  %1037 = vmatprep.mubr.bf16.mxu1 %v828_v7 }
 0x1bf   : > { %v2514_v16 = vadd.f32 %v644_v10, %v2441_v48  ;;  %v646_v17 = vpop.f32.mrb[26].mxu0  ;;  %v1805_v18 = vpop.eup %1804  ;;  %v775_v23 = vadd.f32 1.0, %v1803_v11  ;;  %1038 = vmatmul.mubr.bf16.gmra.mrb[12].mxu1 %v827_v0  ;;  %v805_v30 = vmul.f32 %v773_v8, %v677_v12 }
 0x1c0   : > { %v717_v24 = vmul.f32 0.70710677, %v2510_v9  ;;  %v648_v26 = vpop.f32.mrb[27].mxu0  ;;  %v776_v28 = vadd.f32 1.0, %v1805_v18  ;;  %v647_v13 = vadd.f32 %v646_v17, %v2439_v47  ;;  %v806_v33 = vmul.f32 %v774_v14, %v678_v19 }
 0x1c1   : > { %v718_v29 = vmul.f32 0.70710677, %v2514_v16  ;;  %v807_v15 = vmul.f32 %v775_v23, %v679_v22  ;;  %v649_v32 = vadd.f32 %v648_v26, %v2441_v48  ;;  %v685_v8 = vmul.f32 0.5, %v2510_v9 }
 0x1c2   : > { %1814 = verf.f32 %v717_v24  ;;  %v808_v20 = vmul.f32 %v776_v28, %v680_v27  ;;  %v719_v21 = vmul.f32 0.70710677, %v647_v13  ;;  %v687_v10 = vmul.f32 0.5, %v647_v13 }
 0x1c3   : > { %1816 = verf.f32 %v718_v29  ;;  %v720_v35 = vmul.f32 0.70710677, %v649_v32  ;;  %v829_v31 = vpack.c.bf16 %v807_v15, %v805_v30  ;;  %v686_v11 = vmul.f32 0.5, %v2514_v16 }
 0x1c4   : > { %v1807_v25 = vpop.eup %1806  ;;  %1818 = verf.f32 %v719_v21  ;;  %v830_v37 = vpack.c.bf16 %v808_v20, %v806_v33  ;;  %v688_v12 = vmul.f32 0.5, %v649_v32 }
 0x1c5   : > { %v1809_v36 = vpop.eup %1808  ;;  %v652_v34 = vpop.f32.mrb[28].mxu0  ;;  %v777_v38 = vadd.f32 1.0, %v1807_v25  ;;  %1820 = verf.f32 %v720_v35 }
 0x1c6   : > { %v653_v39 = vadd.f32 %v652_v34, %v2439_v47  ;;  %v654_v40 = vpop.f32.mrb[29].mxu0  ;;  %v1811_v42 = vpop.eup %1810  ;;  %v778_v44 = vadd.f32 1.0, %v1809_v36  ;;  %1045 = vmatprep.mubr.bf16.mxu1 %v830_v37 }
 0x1c7   : > { %v655_v46 = vadd.f32 %v654_v40, %v2441_v48  ;;  %v656_v50 = vpop.f32.mrb[30].mxu0  ;;  %v1813_v51 = vpop.eup %1812  ;;  %v779_v55 = vadd.f32 1.0, %v1811_v42  ;;  %1046 = vmatmul.mubr.bf16.gmra.mrb[16].mxu1 %v829_v31  ;;  %v809_v61 = vmul.f32 %v777_v38, %v681_v43  ;;  %v837_v38 = vld [vmem:[#allocation2] sm:$0xff] }
 0x1c8   : > { %v721_v56 = vmul.f32 0.70710677, %v653_v39  ;;  %v658_v57 = vpop.f32.mrb[31].mxu0  ;;  %v780_v59 = vadd.f32 1.0, %v1813_v51  ;;  %v657_v41 = vadd.f32 %v656_v50, %v2439_v47  ;;  %v810_v62 = vmul.f32 %v778_v44, %v682_v52 }
 0x1c9   : > { %v722_v60 = vmul.f32 0.70710677, %v655_v46  ;;  %v811_v63 = vmul.f32 %v779_v55, %v683_v54  ;;  %v659_v53 = vadd.f32 %v658_v57, %v2441_v48  ;;  %v689_v13 = vmul.f32 0.5, %v653_v39  ;;  %v838_v39 = vld [vmem:[#allocation2 + $0x8] sm:$0xff]  ;;  %v839_v54 = vld [vmem:[#allocation2 + $0x10] sm:$0xff] }
 0x1ca   : > { %1822 = verf.f32 %v721_v56  ;;  %v812_v2 = vmul.f32 %v780_v59, %v684_v58  ;;  %v723_v49 = vmul.f32 0.70710677, %v657_v41  ;;  %v691_v15 = vmul.f32 0.5, %v657_v41  ;;  %v840_v58 = vld [vmem:[#allocation2 + $0x18] sm:$0xff] }
 0x1cb   : > { %1824 = verf.f32 %v722_v60  ;;  %v724_v4 = vmul.f32 0.70710677, %v659_v53  ;;  %v831_v3 = vpack.c.bf16 %v811_v63, %v809_v61  ;;  %v690_v16 = vmul.f32 0.5, %v655_v46 }
 0x1cc   : > { %v1815_v45 = vpop.eup %1814  ;;  %1826 = verf.f32 %v723_v49  ;;  %v832_v5 = vpack.c.bf16 %v812_v2, %v810_v62  ;;  %v692_v32 = vmul.f32 0.5, %v659_v53  ;;  %v841_v53 = vld [vmem:[#allocation2 + $0x20] sm:$0xff] }
 0x1cd   : > { %v1817_v0 = vpop.eup %1816  ;;  %v781_v1 = vadd.f32 1.0, %v1815_v45  ;;  %1828 = verf.f32 %v724_v4  ;;  %v842_v45 = vld [vmem:[#allocation2 + $0x28] sm:$0xff] }
 0x1ce   : > { %v1819_v6 = vpop.eup %1818  ;;  %v782_v7 = vadd.f32 1.0, %v1817_v0  ;;  %1053 = vmatprep.mubr.bf16.mxu1 %v832_v5 }
 0x1cf   : > { %v1821_v47 = vpop.eup %1820  ;;  %v783_v48 = vadd.f32 1.0, %v1819_v6  ;;  %1054 = vmatmul.mubr.bf16.gmra.mrb[20].mxu1 %v831_v3  ;;  %v813_v17 = vmul.f32 %v781_v1, %v685_v8  ;;  %v843_v6 = vld [vmem:[#allocation2 + $0x30] sm:$0xff] }
 0x1d0   : > { %v784_v14 = vadd.f32 1.0, %v1821_v47  ;;  %v814_v19 = vmul.f32 %v782_v7, %v686_v11 }
 0x1d1   : > { %v815_v18 = vmul.f32 %v783_v48, %v687_v10  ;;  %v844_v10 = vld [vmem:[#allocation2 + $0x38] sm:$0xff] }
 0x1d2   : > { %v816_v22 = vmul.f32 %v784_v14, %v688_v12 }
 0x1d3   : > { %v833_v24 = vpack.c.bf16 %v815_v18, %v813_v17  ;;  %v845_v18 = vld [vmem:[#allocation2 + $0x40] sm:$0xff] }
 0x1d4   : > { %v1823_v23 = vpop.eup %1822  ;;  %v834_v27 = vpack.c.bf16 %v816_v22, %v814_v19 }
 0x1d5   : > { %v1825_v26 = vpop.eup %1824  ;;  %v785_v28 = vadd.f32 1.0, %v1823_v23 }
 0x1d6   : > { %v1827_v29 = vpop.eup %1826  ;;  %v786_v30 = vadd.f32 1.0, %v1825_v26  ;;  %1061 = vmatprep.mubr.bf16.mxu1 %v834_v27 }
 0x1d7   : > { %v1829_v9 = vpop.eup %1828  ;;  %v787_v33 = vadd.f32 1.0, %v1827_v29  ;;  %1062 = vmatmul.mubr.bf16.gmra.mrb[24].mxu1 %v833_v24  ;;  %v817_v21 = vmul.f32 %v785_v28, %v689_v13  ;;  %v846_v24 = vld [vmem:[#allocation2 + $0x48] sm:$0xff] }
 0x1d8   : > { %v788_v20 = vadd.f32 1.0, %v1829_v9  ;;  %v818_v35 = vmul.f32 %v786_v30, %v690_v16  ;;  %v847_v9 = vld [vmem:[#allocation2 + $0x50] sm:$0xff]  ;;  %v848_v16 = vld [vmem:[#allocation2 + $0x58] sm:$0xff] }
 0x1d9   : > { %v819_v25 = vmul.f32 %v787_v33, %v691_v15 }
 0x1da   : > { %v820_v31 = vmul.f32 %v788_v20, %v692_v32 }
 0x1db   : > { %v835_v36 = vpack.c.bf16 %v819_v25, %v817_v21 }
 0x1dc   : > { %v836_v34 = vpack.c.bf16 %v820_v31, %v818_v35  ;;  %v849_v31 = vld [vmem:[#allocation2 + $0x60] sm:$0xff] }
 0x1de   : > { %1069 = vmatprep.mubr.bf16.mxu1 %v836_v34 }
 0x1df   : > { %1070 = vmatmul.mubr.bf16.gmra.mrb[28].mxu1 %v835_v36 }
 0x27a   : > { %v1549_v37 = vpop.f32.mrb[0].mxu1 }
 0x27b   : > { %v1550_v40 = vpop.f32.mrb[1].mxu1 }
 0x27c   : > { %v1551_v42 = vadd.f32 %v1550_v40, %v1549_v37  ;;  %v1552_v43 = vpop.f32.mrb[2].mxu1 }
 0x27d   : > { %v1553_v44 = vpop.f32.mrb[3].mxu1 }
 0x27e   : > { %v1078_v50 = vadd.f32 %v1551_v42, %v837_v38  ;;  %v1554_v51 = vadd.f32 %v1553_v44, %v1552_v43  ;;  %v850_v38 = vld [vmem:[#allocation2 + $0x68] sm:$0xff] }
 0x280   : > { %1094 = vst [vmem:[#allocation2] sm:$0xff] %v1078_v50  ;;  %v1079_v46 = vadd.f32 %v1554_v51, %v838_v39  ;;  %v851_v50 = vld [vmem:[#allocation2 + $0x70] sm:$0xff] }
 0x282   : > { %1095 = vst [vmem:[#allocation2 + $0x8] sm:$0xff] %v1079_v46  ;;  %v1555_v52 = vpop.f32.mrb[4].mxu1 }
 0x283   : > { %v1556_v55 = vpop.f32.mrb[5].mxu1 }
 0x284   : > { %v1557_v56 = vadd.f32 %v1556_v55, %v1555_v52  ;;  %v1558_v57 = vpop.f32.mrb[6].mxu1 }
 0x285   : > { %v1559_v59 = vpop.f32.mrb[7].mxu1 }
 0x286   : > { %v1080_v60 = vadd.f32 %v1557_v56, %v839_v54  ;;  %v1560_v41 = vadd.f32 %v1559_v59, %v1558_v57  ;;  %v852_v54 = vld [vmem:[#allocation2 + $0x78] sm:$0xff] }
 0x287   : > { %v1114_v59 = vld [vmem:[#allocation2] sm:$0xff] (!%p1443_p2) }
 0x288   : > { %1096 = vst [vmem:[#allocation2 + $0x10] sm:$0xff] %v1080_v60  ;;  %v1081_v61 = vadd.f32 %v1560_v41, %v840_v58  ;;  %v1444_v41 = vld [vmem:[%s2661_s18] ss:$0 sm:$0xff] (!%p1443_p2) }
 0x289   : > { %v1115_v60 = vld [vmem:[#allocation2 + $0x8] sm:$0xff] (!%p1443_p2) }
 0x28a   : > { %1097 = vst [vmem:[#allocation2 + $0x18] sm:$0xff] %v1081_v61  ;;  %v1561_v63 = vpop.f32.mrb[8].mxu1  ;;  %v1137_v61 = vadd.f32 (!%p1443_p2), %v1444_v41, %v1114_v59 }
 0x28b   : > { %v1562_v62 = vpop.f32.mrb[9].mxu1 }
 0x28c   : > { %v1563_v2 = vadd.f32 %v1562_v62, %v1561_v63  ;;  %v1564_v49 = vpop.f32.mrb[10].mxu1  ;;  %v1138_v63 = vadd.f32 (!%p1443_p2), %v1444_v41, %v1115_v60 }
 0x28d   : > { %v1565_v4 = vpop.f32.mrb[11].mxu1 }
 0x28e   : > { %v1082_v3 = vadd.f32 %v1563_v2, %v841_v53  ;;  %v1566_v0 = vadd.f32 %v1565_v4, %v1564_v49 }
 0x28f   : > { %v1116_v53 = vld [vmem:[#allocation2 + $0x10] sm:$0xff] (!%p1443_p2) }
 0x290   : > { %1098 = vst [vmem:[#allocation2 + $0x20] sm:$0xff] %v1082_v3  ;;  %v1083_v5 = vadd.f32 %v1566_v0, %v842_v45  ;;  %v1139_v49 = vadd.f32 (!%p1443_p2), %v1444_v41, %v1116_v53 }
 0x291   : > { %v1117_v62 = vld [vmem:[#allocation2 + $0x18] sm:$0xff] (!%p1443_p2) }
 0x292   : > { %1099 = vst [vmem:[#allocation2 + $0x28] sm:$0xff] %v1083_v5  ;;  %v1567_v1 = vpop.f32.mrb[12].mxu1  ;;  %v1140_v45 = vadd.f32 (!%p1443_p2), %v1444_v41, %v1117_v62 }
 0x293   : > { %v1568_v7 = vpop.f32.mrb[13].mxu1 }
 0x294   : > { %v1569_v47 = vadd.f32 %v1568_v7, %v1567_v1  ;;  %v1570_v8 = vpop.f32.mrb[14].mxu1  ;;  %v1489_v1 = vpack.c.bf16 (!%p1443_p2), %v1138_v63, %v1137_v61 }
 0x295   : > { %v1571_v48 = vpop.f32.mrb[15].mxu1 }
 0x296   : > { %v1084_v11 = vadd.f32 %v1569_v47, %v843_v6  ;;  %v1572_v12 = vadd.f32 %v1571_v48, %v1570_v8  ;;  %1490 = vst [vmem:[%s2391_s9] sm:$0xff] (!%p1443_p2), %v1489_v1  }
 0x297   : > { %v1118_v2 = vld [vmem:[#allocation2 + $0x20] sm:$0xff] (!%p1443_p2) }
 0x298   : > { %1100 = vst [vmem:[#allocation2 + $0x30] sm:$0xff] %v1084_v11  ;;  %v1085_v14 = vadd.f32 %v1572_v12, %v844_v10  ;;  %v1141_v3 = vadd.f32 (!%p1443_p2), %v1444_v41, %v1118_v2  ;;  %v1494_v11 = vpack.c.bf16 (!%p1443_p2), %v1140_v45, %v1139_v49 }
 0x299   : > { %v1119_v4 = vld [vmem:[#allocation2 + $0x28] sm:$0xff] (!%p1443_p2) }
 0x29a   : > { %1101 = vst [vmem:[#allocation2 + $0x38] sm:$0xff] %v1085_v14  ;;  %v1573_v17 = vpop.f32.mrb[16].mxu1  ;;  %v1142_v6 = vadd.f32 (!%p1443_p2), %v1444_v41, %v1119_v4  ;;  %1526 = vst [vmem:[%s2391_s9 + $0x8] sm:$0xff] (!%p1443_p2), %v1494_v11  }
 0x29b   : > { %v1574_v19 = vpop.f32.mrb[17].mxu1 }
 0x29c   : > { %v1575_v22 = vadd.f32 %v1574_v19, %v1573_v17  ;;  %v1576_v23 = vpop.f32.mrb[18].mxu1 }
 0x29d   : > { %v1577_v26 = vpop.f32.mrb[19].mxu1 }
 0x29e   : > { %v1086_v27 = vadd.f32 %v1575_v22, %v845_v18  ;;  %v1578_v28 = vadd.f32 %v1577_v26, %v1576_v23  ;;  %v1499_v23 = vpack.c.bf16 (!%p1443_p2), %v1142_v6, %v1141_v3 }
 0x29f   : > { %v1120_v0 = vld [vmem:[#allocation2 + $0x30] sm:$0xff] (!%p1443_p2) }
 0x2a0   : > { %1102 = vst [vmem:[#allocation2 + $0x40] sm:$0xff] %v1086_v27  ;;  %v1087_v29 = vadd.f32 %v1578_v28, %v846_v24  ;;  %v1143_v7 = vadd.f32 (!%p1443_p2), %v1444_v41, %v1120_v0  ;;  %1527 = vst [vmem:[%s2391_s9 + $0x10] sm:$0xff] (!%p1443_p2), %v1499_v23  }
 0x2a1   : > { %v1121_v5 = vld [vmem:[#allocation2 + $0x38] sm:$0xff] (!%p1443_p2) }
 0x2a2   : > { %1103 = vst [vmem:[#allocation2 + $0x48] sm:$0xff] %v1087_v29  ;;  %v1579_v30 = vpop.f32.mrb[20].mxu1  ;;  %v1144_v47 = vadd.f32 (!%p1443_p2), %v1444_v41, %v1121_v5 }
 0x2a3   : > { %v1580_v13 = vpop.f32.mrb[21].mxu1 }
 0x2a4   : > { %v1581_v15 = vadd.f32 %v1580_v13, %v1579_v30  ;;  %v1582_v33 = vpop.f32.mrb[22].mxu1  ;;  %v1504_v24 = vpack.c.bf16 (!%p1443_p2), %v1144_v47, %v1143_v7 }
 0x2a5   : > { %v1583_v32 = vpop.f32.mrb[23].mxu1 }
 0x2a6   : > { %v1088_v20 = vadd.f32 %v1581_v15, %v847_v9  ;;  %v1584_v21 = vadd.f32 %v1583_v32, %v1582_v33  ;;  %1528 = vst [vmem:[%s2391_s9 + $0x18] sm:$0xff] (!%p1443_p2), %v1504_v24  }
 0x2a7   : > { %v1122_v8 = vld [vmem:[#allocation2 + $0x40] sm:$0xff] (!%p1443_p2) }
 0x2a8   : > { %1104 = vst [vmem:[#allocation2 + $0x50] sm:$0xff] %v1088_v20  ;;  %v1089_v25 = vadd.f32 %v1584_v21, %v848_v16  ;;  %v1145_v12 = vadd.f32 (!%p1443_p2), %v1444_v41, %v1122_v8 }
 0x2a9   : > { %v1123_v10 = vld [vmem:[#allocation2 + $0x48] sm:$0xff] (!%p1443_p2) }
 0x2aa   : > { %1105 = vst [vmem:[#allocation2 + $0x58] sm:$0xff] %v1089_v25  ;;  %v1585_v35 = vpop.f32.mrb[24].mxu1  ;;  %v1146_v14 = vadd.f32 (!%p1443_p2), %v1444_v41, %v1123_v10 }
 0x2ab   : > { %v1586_v36 = vpop.f32.mrb[25].mxu1 }
 0x2ac   : > { %v1587_v34 = vadd.f32 %v1586_v36, %v1585_v35  ;;  %v1588_v37 = vpop.f32.mrb[26].mxu1  ;;  %v1509_v30 = vpack.c.bf16 (!%p1443_p2), %v1146_v14, %v1145_v12 }
 0x2ad   : > { %v1589_v40 = vpop.f32.mrb[27].mxu1 }
 0x2ae   : > { %v1090_v42 = vadd.f32 %v1587_v34, %v849_v31  ;;  %v1590_v43 = vadd.f32 %v1589_v40, %v1588_v37  ;;  %1529 = vst [vmem:[%s2391_s9 + $0x20] sm:$0xff] (!%p1443_p2), %v1509_v30  }
 0x2af   : > { %v1124_v48 = vld [vmem:[#allocation2 + $0x50] sm:$0xff] (!%p1443_p2) }
 0x2b0   : > { %1106 = vst [vmem:[#allocation2 + $0x60] sm:$0xff] %v1090_v42  ;;  %v1091_v39 = vadd.f32 %v1590_v43, %v850_v38  ;;  %v1147_v18 = vadd.f32 (!%p1443_p2), %v1444_v41, %v1124_v48 }
 0x2b1   : > { %v1125_v17 = vld [vmem:[#allocation2 + $0x58] sm:$0xff] (!%p1443_p2) }
 0x2b2   : > { %1107 = vst [vmem:[#allocation2 + $0x68] sm:$0xff] %v1091_v39  ;;  %v1591_v44 = vpop.f32.mrb[28].mxu1  ;;  %v1148_v26 = vadd.f32 (!%p1443_p2), %v1444_v41, %v1125_v17 }
 0x2b3   : > { %v1592_v51 = vpop.f32.mrb[29].mxu1 }
 0x2b4   : > { %v1593_v46 = vadd.f32 %v1592_v51, %v1591_v44  ;;  %v1594_v52 = vpop.f32.mrb[30].mxu1  ;;  %1113 = sbr.rel (%p1443_p2) target bundleno = 711 (0x2c7), region = 60  ;;  %v1514_v33 = vpack.c.bf16 (!%p1443_p2), %v1148_v26, %v1147_v18 }
 0x2b5   : > { %v1595_v55 = vpop.f32.mrb[31].mxu1 }
 0x2b6   : > { %v1092_v56 = vadd.f32 %v1593_v46, %v851_v50  ;;  %v1596_v57 = vadd.f32 %v1595_v55, %v1594_v52  ;;  %1530 = vst [vmem:[%s2391_s9 + $0x28] sm:$0xff] (!%p1443_p2), %v1514_v33  }
 0x2b7   : > { %v1126_v19 = vld [vmem:[#allocation2 + $0x60] sm:$0xff] (!%p1443_p2) }
 0x2b8   : > { %1108 = vst [vmem:[#allocation2 + $0x70] sm:$0xff] %v1092_v56  ;;  %v1093_v58 = vadd.f32 %v1596_v57, %v852_v54  ;;  %v1149_v27 = vadd.f32 (!%p1443_p2), %v1444_v41, %v1126_v19 }
 0x2b9   : > { %v1127_v22 = vld [vmem:[#allocation2 + $0x68] sm:$0xff] (!%p1443_p2) }
 0x2ba   : > { %1109 = vst [vmem:[#allocation2 + $0x78] sm:$0xff] %v1093_v58  ;;  %v1150_v9 = vadd.f32 (!%p1443_p2), %v1444_v41, %v1127_v22 }
 0x2bc   : > { %v1519_v16 = vpack.c.bf16 %v1150_v9, %v1149_v27 }
 0x2be   : > { %1531 = vst [vmem:[%s2391_s9 + $0x30] sm:$0xff] %v1519_v16  }
 0x2bf   : > { %v1128_v28 = vld [vmem:[#allocation2 + $0x70] sm:$0xff] }
 0x2c0   : > { %v1151_v13 = vadd.f32 %v1444_v41, %v1128_v28 }
 0x2c1   : > { %v1129_v29 = vld [vmem:[#allocation2 + $0x78] sm:$0xff] }
 0x2c2   : > { %v1152_v15 = vadd.f32 %v1444_v41, %v1129_v29 }
 0x2c4   : > { %v1524_v32 = vpack.c.bf16 %v1152_v15, %v1151_v13 }
 0x2c6   : > { %1532 = vst [vmem:[%s2391_s9 + $0x38] sm:$0xff] %v1524_v32  }
 0x2c7 PF: > { %s2662_s24 = sld [smem:[#allocation15_spill]]  ;;  %s1247_s8 = sshll.u32 %s2391_s9, 4  ;;  %s2550_s8 = int_to_ptr.vmem [resolvable:$true] %s1247_s8 }
 0x2c8   : > { %s2663_s7 = sld [smem:[#allocation23_spill]]  ;;  %s1234_s23 = scalar_lea.sflag [#allocation5], %s2364_s20 }
 0x2c9   : > { %s1920_s4 = scalar_lea.vmem %s2550_s8, 1024  ;;  %p2664_p11 = scmp.ne.s32.totalorder %s2651_s14, 0 }
 0x2ca   : > { %p1921_p13 = scmp.ne.s32.totalorder %s2550_s8, %s1920_s4  ;;  %s2058_s15 = smov [#allocation9]  }
 0x2cb   : > { %s1924_s30 = sshll.u32 %s2058_s15, 4  ;;  %s1925_s30 = int_to_ptr.vmem [resolvable:$false] %s1924_s30 }
 0x2cc   : > { %p1922_p6 = pnand %p1921_p13, %p2664_p11  ;;  %s1926_s13 = scalar_lea.vmem %s1925_s30, 2048 }
 0x2cd   : > { %s1485_s27 = sshll.u32 %s2662_s24, 10  ;;  %p1927_p1 = scmp.lt.s32.totalorder %s2550_s8, %s1925_s30 }
 0x2ce   : > { %s2547_s6 = scalar_lea.hbm %s2663_s7, %s1485_s27  ;;  %p1923_p5 = pneg %p1922_p6 }
 0x2cf   : > { %p1928_p0 = scmp.lt.s32.totalorder %s1926_s13, %s1920_s4 }
 0x2d1   : > { %p1929_p9 = por %p1928_p0, %p1927_p1 }
 0x2d3   : > { %p1930_p12 = pnand %p1929_p9, %p1923_p5 }
 0x2d5   : > { %1933 = shalt.err (!%p1930_p12)
}
 0x2d6   : > { %s1934_s12 = scalar_lea.hbm %s2547_s6, 1024  ;;  %s1938_s17 = scalar_lea.hbm %s2663_s7, 4096 }
 0x2d7   : > { %p1935_p3 = scmp.ne.s32.totalorder %s2547_s6, %s1934_s12  ;;  %p1939_p8 = scmp.lt.u32.totalorder %s2547_s6, %s2663_s7 }
 0x2d8   : > { %p1940_p10 = scmp.lt.u32.totalorder %s1938_s17, %s1934_s12  ;;  %p1942_p13 = scmp.lt.u32.totalorder %s1934_s12, %s2547_s6 }
 0x2d9   : > { %p1936_p4 = pnand %p1935_p3, %p2664_p11 }
 0x2da   : > { %p1941_p2 = por %p1940_p10, %p1939_p8 }
 0x2db   : > { %p1937_p7 = pneg %p1936_p4 }
 0x2dc   : > { %p1943_p6 = por %p1942_p13, %p1941_p2 }
 0x2de   : > { %p1944_p5 = pnand %p1943_p6, %p1937_p7 }
 0x2e0   : > { %1947 = shalt.err (!%p1944_p5)
}
 0x2e1   : > { %s2059_s16 = smov 64   ;;  %s2060_s18 = smov 4  }
 0x2e2   : > { %1603 = dma.vmem_to_hbm [thread:$0]  (%p2664_p11), %s2550_s8, 1024, %s2547_s6, %s1234_s23, %s2059_s16, %s2059_s16, %s2060_s18  }
 0x2e3 PF: > { %p1620_p1 = scmp.ge.s32.totalorder %s2046_s28, 2  ;;  %s1262_s24 = sand.u32 1, %s2018_s21  }
 0x2e4   : > { %p2665_p0 = scmp.ne.s32.totalorder %s2653_s5, 0  ;;  %s1263_s27 = scalar_lea.sflag [#allocation5], %s1262_s24 }
 0x2e6   : > { %p1616_p9 = pnand %p1620_p1, %p2665_p0 }
 0x2e8   : > { %2001 = dma.done.wait (!%p1616_p9), %s1263_s27, 1024  }
 0x2e9   : > { %2003 = vsyncadd (!%p1616_p9), %s1263_s27, 4294966272  ;;  %s24_s28 = sadd.s32 1, %s2046_s28   ;;  %s2666_s11 = sld [smem:[#allocation13_spill]] }
 0x2ea   : > { %p21_p12 = scmp.ge.s32.totalorder %s24_s28, 10   ;;  %s2667_s20 = sld [smem:[#allocation18_spill]] }
 0x2eb   : > { %s2668_s14 = sld [smem:[#allocation14_spill]]  ;;  %s2669_s23 = sld [smem:[#allocation20_spill]] }
 0x2ec   : > { %s2670_s25 = sld [smem:[#allocation16_spill]]  ;;  %s2671_s29 = sld [smem:[#allocation17_spill]] }
 0x2ed   : > { %s2672_s27 = sld [smem:[#allocation19_spill]]  ;;  %s2673_s18 = smov %s2010_s19 }
 0x2ee   : > { %s2675_s21 = smov %s2022_s22  ;;  %s2677_s24 = smov %s2038_s26 }
 0x2ef   : > { %s2674_s19 = smov %s2666_s11  ;;  %23 = sbr.rel (!%p21_p12) target bundleno = 15 (0xf), region = 120 }
 0x2f1   : > { %s2676_s22 = smov %s2668_s14 }
 0x2f2   : > { %s2678_s26 = smov %s2671_s29 }
 0x2f6   :  { %1268 = vsyncpa [#allocation4], 1 }
 0x2f7   :  { %1270 = vsyncpa [#allocation4 + $0x1], 1 }
 0x2f8   :  { %1271 = vsyncpa [#allocation7], 1 }
 0x2f9   :  { %1273 = vsyncpa [#allocation7 + $0x1], 1 }
 0x2fa   :  { %1274 = vsyncpa [#allocation5], 1 }
 0x2fb   :  { %1276 = vsyncpa [#allocation5 + $0x1], 1 }

</bundles_post_ra>
